<compile_context>
chip_gen: v7x
topology: tpu7x:2x2x1
jax: 0.10.0
libtpu: 0.0.40
codegen_flags: <defaults>
</compile_context>

<pallas_src>
import numpy as np
import jax
import jax.numpy as jnp
from jax.experimental import pallas as pl
from jax.experimental.pallas import tpu as pltpu

HP = jax.lax.Precision.HIGHEST


# ----------------------------------------------------------------------------
# Host-side deterministic buffer construction (fixed, non-learned buffers only)
# ----------------------------------------------------------------------------

def lmu_transition(N):
    # transition('lmu', N) from the reference code
    Q = np.arange(N, dtype=np.float64)
    R = (2 * Q + 1)[:, None]
    j, i = np.meshgrid(Q, Q)
    A = np.where(i < j, -1.0, (-1.0) ** (i - j + 1)) * R
    B = (-1.0) ** Q[:, None] * R
    return A, B


def bilinear_discretize(A, B, dt):
    # scipy.signal.cont2discrete(..., method='bilinear') == gbt with alpha = 0.5
    N = A.shape[0]
    I = np.eye(N)
    ima = I - 0.5 * dt * A
    Ad = np.linalg.solve(ima, I + 0.5 * dt * A)
    Bd = np.linalg.solve(ima, dt * B)
    return Ad, Bd


def eval_legendre_matrix(N, x):
    # (len(x), N) with entry [t, n] = P_n(x[t])   (scipy.special.eval_legendre)
    x = np.asarray(x, dtype=np.float64)
    out = np.zeros((x.shape[0], N), dtype=np.float64)
    p_prev = np.ones_like(x)
    out[:, 0] = p_prev
    if N > 1:
        p_cur = x.copy()
        out[:, 1] = p_cur
        for n in range(1, N - 1):
            p_next = ((2 * n + 1) * x * p_cur - n * p_prev) / (n + 1)
            out[:, n + 1] = p_next
            p_prev, p_cur = p_cur, p_next
    return out


# ----------------------------------------------------------------------------
# Pallas kernel: one lane-dense matmul against the fully folded forecast matrix
# ----------------------------------------------------------------------------

def _forecast_matmul_kernel(f_ref, k_ref, o_ref):
    # All HiPPO-scan / rfft / spectral-mix / irfft-column / Legendre-reconstruction
    # linear algebra is already folded into k_ref (Tw, S*P), so the kernel streams
    # only a few KiB and does one tiny MXU matmul.  HIGHEST precision is free here
    # (8x32x24) and keeps the accuracy of the host/f32-composed operands.
    o_ref[...] = jnp.dot(f_ref[...], k_ref[...],
                         preferred_element_type=jnp.float32,
                         precision=HP)


def film_forecast_pallas(f, kall):
    """f: (M, Tw) normalized window rows (batch, channel); kall: (Tw, S*P)."""
    M, Tw = f.shape
    SP = kall.shape[1]
    tm = M if M <= 512 else 256              # row tile; single block at demo shapes
    tm = ((tm + 7) // 8) * 8                 # sublane multiple
    Mp = ((M + tm - 1) // tm) * tm
    if Mp != M:
        f = jnp.pad(f, ((0, Mp - M), (0, 0)))
    out = pl.pallas_call(
        _forecast_matmul_kernel,
        out_shape=jax.ShapeDtypeStruct((Mp, SP), jnp.float32),
        grid=(Mp // tm,),
        in_specs=[
            pl.BlockSpec((tm, Tw), lambda i: (i, 0)),
            pl.BlockSpec((Tw, SP), lambda i: (0, 0)),     # folded forecast matrix
        ],
        out_specs=pl.BlockSpec((tm, SP), lambda i: (i, 0)),
        compiler_params=pltpu.CompilerParams(
            dimension_semantics=("parallel",)),
    )(f, kall)
    return out[:M]


# ----------------------------------------------------------------------------
# Parameter / buffer construction
# ----------------------------------------------------------------------------

def build_params(key, cfg):
    N = cfg['hippo_N']
    P = cfg['pred_len']
    E = cfg['enc_in']
    m = cfg['modes2']
    L = cfg['seq_len']
    scales = cfg['multiscale']
    S = len(scales)
    Teffs = [min(L, mult * P) for mult in scales]   # actual scan length per scale
    Tw = max(Teffs)                                 # shared window length

    A_c, B_c = lmu_transition(N)

    kyr64 = np.zeros((S, Tw, N, m), np.float64)
    kyi64 = np.zeros((S, Tw, N, m), np.float64)
    evt = np.zeros((S, N, P), np.float32)
    A_f32 = np.zeros((S, N, N), np.float32)
    B_f32 = np.zeros((S, N), np.float32)
    eval_full = []                                  # per-scale (mult*P, N) float32
    wr_list, wi_list = [], []

    for si, mult in enumerate(scales):
        dt = 1.0 / P / mult
        Ad, Bd = bilinear_discretize(A_c, B_c, dt)
        # quantize to f32 exactly like the registered PyTorch buffers, then use those
        # values (in f64) everywhere so host-composed and scanned paths match.
        Ad32 = Ad.astype(np.float32)
        Bd32 = Bd.reshape(-1).astype(np.float32)
        A_f32[si] = Ad32
        B_f32[si] = Bd32
        AdT = Ad32.astype(np.float64).T
        Brow = Bd32.astype(np.float64)

        Teff = Teffs[si]
        t0 = P - 1 if L >= P else Teff - 1          # irfft column actually consumed

        # Kd[d] = B_row @ (A^T)^d   so   c_t = sum_{s<=t} f_s * Kd[t-s]
        Kd = np.zeros((Teff, N), np.float64)
        v = Brow.copy()
        for d in range(Teff):
            Kd[d] = v
            v = v @ AdT

        # causal scan kernel composed with truncated rfft (cos / -sin)
        k_idx = np.arange(m, dtype=np.float64)
        t_idx = np.arange(Teff, dtype=np.float64)
        ang = 2.0 * np.pi * np.outer(t_idx, k_idx) / Teff          # (Teff, m)
        Cmat = np.cos(ang)
        Smat = -np.sin(ang)
        Kc = np.zeros((Teff, N, m), np.float64)
        Ks = np.zeros((Teff, N, m), np.float64)
        for s in range(Teff):
            Kc[s] = Kd[:Teff - s].T @ Cmat[s:]                     # (N, m)
            Ks[s] = Kd[:Teff - s].T @ Smat[s:]

        # single irfft column (time index t0):  a_k * Re + b_k * Im
        sck = np.where(k_idx == 0, 1.0, 2.0) / Teff
        a = sck * np.cos(2.0 * np.pi * k_idx * t0 / Teff)
        b = -sck * np.sin(2.0 * np.pi * k_idx * t0 / Teff)
        b[0] = 0.0                        # irfft ignores imag part of the DC bin
        kyr_i = Kc * a[None, None, :] + Ks * b[None, None, :]
        kyi_i = Kc * b[None, None, :] - Ks * a[None, None, :]

        # embed at row offset Tw - Teff so a single shared last-Tw window works
        kyr64[si, Tw - Teff:] = kyr_i
        kyi64[si, Tw - Teff:] = kyi_i

        vals = np.arange(0.0, 1.0, dt)
        ev = eval_legendre_matrix(N, 1.0 - 2.0 * vals).astype(np.float32)  # (mult*P, N)
        eval_full.append(ev)
        evt[si] = ev[-P:, :].T

        # SpectralConv1d weights1 = scale * rand(in, out, modes) complex
        key, k1, k2 = jax.random.split(key, 3)
        scale_w = 1.0 / (N * N)
        wr_list.append(scale_w * jax.random.uniform(k1, (N, N, m), jnp.float32))
        wi_list.append(scale_w * jax.random.uniform(k2, (N, N, m), jnp.float32))

    key, km1, km2 = jax.random.split(key, 3)
    bound = 1.0 / np.sqrt(S)
    params = {
        'affine_weight': jnp.ones((1, 1, E), jnp.float32),
        'affine_bias': jnp.zeros((1, 1, E), jnp.float32),
        'kyr': jnp.asarray(kyr64.astype(np.float32)),   # (S, Tw, N, m) fixed buffers
        'kyi': jnp.asarray(kyi64.astype(np.float32)),
        'evt': jnp.asarray(evt),                        # (S, N, P)    fixed buffer
        'wr': jnp.stack(wr_list, 0),                    # (S, N, N, m) learnable (Re)
        'wi': jnp.stack(wi_list, 0),                    # (S, N, N, m) learnable (Im)
        'mlp_w': jax.random.uniform(km1, (1, S), jnp.float32, -bound, bound),
        'mlp_b': jax.random.uniform(km2, (1,), jnp.float32, -bound, bound),
    }
    ref_bufs = {   # float64 / original-layout buffers used only by the NumPy checks
        'A': A_f32, 'B': B_f32, 'eval_full': eval_full,
        'kyr64': kyr64, 'kyi64': kyi64,
    }
    return params, ref_bufs


# ----------------------------------------------------------------------------
# Forward pass (JAX + Pallas)
# ----------------------------------------------------------------------------

def model_forward(x_enc, x_mark_enc, x_dec_true, x_mark_dec, params, cfg,
                  use_pallas=True):
    del x_mark_enc, x_dec_true, x_mark_dec     # unused in the configs.ab == 2 branch
    B, L, E = x_enc.shape
    P = cfg['pred_len']
    scales = cfg['multiscale']
    S = len(scales)
    Tw = max(min(L, mult * P) for mult in scales)

    # D_norm: subtract the last observed value
    seq_last = x_enc[:, -1:, :]
    x = x_enc - seq_last

    # film_ours: RevIN-style instance normalization + affine (trivial jnp ops)
    means = jnp.mean(x, axis=1, keepdims=True)
    x = x - means
    stdev = jnp.sqrt(jnp.var(x, axis=1, keepdims=True) + 1e-5)    # unbiased=False
    x = x / stdev
    x = x * params['affine_weight'] + params['affine_bias']

    # shared last-Tw window, rows ordered (batch, channel)
    f = jnp.transpose(x[:, -Tw:, :], (0, 2, 1)).reshape(B * E, Tw)

    # Fold (per forward, so weights stay learnable) the spectral weights and the fixed
    # Legendre reconstruction into one (Tw, S*P) matrix.  Cheap XLA einsums; HIGHEST
    # precision because these are the accuracy-critical contractions (K = N*m = 1024).
    hk = (jnp.einsum('stik,siok->sto', params['kyr'], params['wr'], precision=HP)
          + jnp.einsum('stik,siok->sto', params['kyi'], params['wi'], precision=HP))
    kall = jnp.einsum('sto,sop->stp', hk, params['evt'], precision=HP)   # (S, Tw, P)
    kall = jnp.transpose(kall, (1, 0, 2)).reshape(Tw, S * P)

    if use_pallas:
        out = film_forecast_pallas(f, kall)                             # (B*E, S*P)
    else:   # identical-math XLA path (plumbing check for the kernel)
        out = jnp.dot(f, kall, preferred_element_type=jnp.float32, precision=HP)

    out = out.reshape(B, E, S, P)

    # mlp over the scale dimension, then (B, P, E)
    x_dec = jnp.einsum('besp,s->bep', out, params['mlp_w'][0]) + params['mlp_b'][0]
    x_dec = jnp.transpose(x_dec, (0, 2, 1))

    # undo affine / normalization / D_norm
    x_dec = x_dec - params['affine_bias']
    x_dec = x_dec / (params['affine_weight'] + 1e-10)
    x_dec = x_dec * stdev
    x_dec = x_dec + means
    x_dec = x_dec + seq_last
    return x_dec


# ----------------------------------------------------------------------------
# float64 NumPy references (correctness checks only)
# ----------------------------------------------------------------------------

def np_reference_forward(x_enc, params, ref_bufs, cfg, ordering="original"):
    """float64 reference.

    ordering="original": exact op ordering of the PyTorch module -- sequential HiPPO
        recurrence, np.fft.rfft, complex spectral einsum, zero-padded irfft, column
        pred_len-1, Legendre reconstruction.
    ordering="composed": the algebraically folded ordering used on device.
    Both use the same float32-quantized buffers/weights (cast to float64).
    """
    x = np.asarray(x_enc, np.float64)
    aw = np.asarray(params['affine_weight'], np.float64)
    ab = np.asarray(params['affine_bias'], np.float64)
    wr = np.asarray(params['wr'], np.float64)
    wi = np.asarray(params['wi'], np.float64)
    mlp_w = np.asarray(params['mlp_w'], np.float64)
    mlp_b = np.asarray(params['mlp_b'], np.float64)

    B, L, E = x.shape
    P = cfg['pred_len']
    N = cfg['hippo_N']
    m = cfg['modes2']
    scales = cfg['multiscale']
    S = len(scales)
    Tw = max(min(L, mult * P) for mult in scales)

    seq_last = x[:, -1:, :]
    x = x - seq_last
    means = x.mean(1, keepdims=True)
    x = x - means
    stdev = np.sqrt(x.var(1, keepdims=True) + 1e-5)
    x = x / stdev
    x = x * aw + ab

    x_decs = []
    if ordering == "composed":
        f = np.transpose(x[:, -Tw:, :], (0, 2, 1)).reshape(B * E, Tw)
        for si in range(S):
            hk = (np.einsum('tik,iok->to', ref_bufs['kyr64'][si], wr[si])
                  + np.einsum('tik,iok->to', ref_bufs['kyi64'][si], wi[si]))
            kall = hk @ np.asarray(params['evt'][si], np.float64)        # (Tw, P)
            x_decs.append((f @ kall).reshape(B, E, P))
    else:
        for si, mult in enumerate(scales):
            T = min(L, mult * P)
            x_in = x[:, -T:, :]                                           # (B, T, E)
            Ad = np.asarray(ref_bufs['A'][si], np.float64)
            Bd = np.asarray(ref_bufs['B'][si], np.float64)
            c = np.zeros((B, E, N))
            cs = np.zeros((T, B, E, N))
            for t in range(T):                  # c = F.linear(c, A) + f * B
                c = c @ Ad.T + x_in[:, t, :][..., None] * Bd[None, None, :]
                cs[t] = c
            x_in_c = np.transpose(cs, (1, 2, 3, 0))                      # (B, E, N, T)
            x_ft = np.fft.rfft(x_in_c, axis=-1)
            w = wr[si] + 1j * wi[si]                                     # (N, N, m)
            out_ft = np.zeros((B, E, N, T // 2 + 1), np.complex128)
            out_ft[..., :m] = np.einsum('bjix,iox->bjox', x_ft[..., :m], w)
            out1 = np.fft.irfft(out_ft, n=T, axis=-1)                    # (B, E, N, T)
            t0 = P - 1 if L >= P else T - 1
            ev = np.asarray(ref_bufs['eval_full'][si], np.float64)       # (mult*P, N)
            x_decs.append(out1[..., t0] @ ev[-P:, :].T)                  # (B, E, P)

    stack = np.stack(x_decs, -1)                                         # (B, E, P, S)
    x_dec = np.einsum('beps,s->bep', stack, mlp_w[0]) + mlp_b[0]
    x_dec = np.transpose(x_dec, (0, 2, 1))
    x_dec = x_dec - ab
    x_dec = x_dec / (aw + 1e-10)
    x_dec = x_dec * stdev
    x_dec = x_dec + means
    x_dec = x_dec + seq_last
    return x_dec


# ----------------------------------------------------------------------------
# Demo / checks
# ----------------------------------------------------------------------------

if __name__ == "__main__":
    B = 2
    ENC_IN = 4
    SEQ_LEN = 32
    LABEL_LEN = 16
    PRED_LEN = 8
    MODES1 = 8
    cfg = {
        'enc_in': ENC_IN,
        'seq_len': SEQ_LEN,
        'pred_len': PRED_LEN,
        'multiscale': [1, 2, 4],      # hard-coded in the PyTorch Model (ab == 2)
        'hippo_N': 256,               # window_size = [256] hard-coded in the Model
        # SpectralConv1d: modes2 = min(modes1, min(pred_len, seq_len) // 2)
        'modes2': min(MODES1, min(PRED_LEN, SEQ_LEN) // 2),
    }

    key = jax.random.PRNGKey(0)
    key, kx = jax.random.split(key)
    params, ref_bufs = build_params(key, cfg)

    x_enc = jax.random.normal(kx, (B, SEQ_LEN, ENC_IN), dtype=jnp.float32)
    x_mark_enc = jnp.zeros((B, SEQ_LEN, 4), jnp.float32)                    # unused
    x_dec_true = jnp.zeros((B, LABEL_LEN + PRED_LEN, ENC_IN), jnp.float32)  # unused
    x_mark_dec = jnp.zeros((B, LABEL_LEN + PRED_LEN, 4), jnp.float32)       # unused

    fwd = jax.jit(lambda a, b_, c, d, p: model_forward(a, b_, c, d, p, cfg))
    out = jax.block_until_ready(fwd(x_enc, x_mark_enc, x_dec_true, x_mark_dec, params))
    assert out.shape == (B, PRED_LEN, ENC_IN), out.shape
    assert bool(jnp.all(jnp.isfinite(out)))

    # (1) algebraic-fold validation, float64 vs float64: original op ordering
    #     (recurrence / rfft / complex mix / irfft / Legendre) vs folded ordering.
    x_np = np.asarray(x_enc)
    ref_orig64 = np_reference_forward(x_np, params, ref_bufs, cfg, "original")
    ref_comp64 = np_reference_forward(x_np, params, ref_bufs, cfg, "composed")
    rel_fold = float(np.linalg.norm(ref_comp64 - ref_orig64)
                     / (np.linalg.norm(ref_orig64) + 1e-30))
    assert rel_fold < 1e-7, f"fold vs original-order mismatch: rel={rel_fold}"

    # (2) tight identical-math check: Pallas matmul path vs plain-XLA matmul path.
    fwd_ref = jax.jit(lambda a, b_, c, d, p: model_forward(a, b_, c, d, p, cfg,
                                                           use_pallas=False))
    ref_same = jax.block_until_ready(
        fwd_ref(x_enc, x_mark_enc, x_dec_true, x_mark_dec, params))
    rel_same = float(jnp.linalg.norm(out - ref_same)
                     / (jnp.linalg.norm(ref_same) + 1e-30))
    assert rel_same < 1e-5, f"pallas vs identical-math XLA mismatch: rel={rel_same}"

    # (3) end-to-end sanity: device f32 path vs float64 original-order reference
    #     (loose only because of f32 accumulation through ill-conditioned HiPPO sums).
    rel_dev = float(np.linalg.norm(np.asarray(out, np.float64) - ref_orig64)
                    / (np.linalg.norm(ref_orig64) + 1e-30))
    assert rel_dev < 1e-2, f"device f32 vs float64 reference mismatch: rel={rel_dev}"

    print("KERNEL_OK")
</pallas_src>

<mosaic_0001>
module attributes {stable_mosaic.version = 11 : i64} {
  func.func @_forecast_matmul_kernel(%arg0: i32, %arg1: memref<8x32xf32, #tpu.memory_space<vmem>>, %arg2: memref<32x24xf32, #tpu.memory_space<vmem>>, %arg3: memref<8x24xf32, #tpu.memory_space<vmem>>) attributes {dimension_semantics = [#tpu.dimension_semantics<parallel>], iteration_bounds = array<i64: 1>, scalar_prefetch = 0 : i64, scratch_operands = 0 : i64, tpu.core_type = #tpu.core_type<tc>, window_params = [{transform_indices = @transform_0, window_bounds = array<i64: 8, 32>}, {pipeline_mode = #tpu.pipeline_mode<synchronous>, transform_indices = @transform_1, window_bounds = array<i64: 32, 24>}, {transform_indices = @transform_2, window_bounds = array<i64: 8, 24>}]} {
    %c0 = arith.constant 0 : index
    %c0_0 = arith.constant 0 : index
    %0 = vector.load %arg1[%c0, %c0_0] : memref<8x32xf32, #tpu.memory_space<vmem>>, vector<8x32xf32>
    %c0_1 = arith.constant 0 : index
    %c0_2 = arith.constant 0 : index
    %1 = vector.load %arg2[%c0_1, %c0_2] : memref<32x24xf32, #tpu.memory_space<vmem>>, vector<32x24xf32>
    %cst = arith.constant dense<0.000000e+00> : vector<8x24xf32>
    %2 = tpu.matmul %0, %1, %cst {dimension_numbers = #tpu.dot_dimension_numbers<[1], [0], [0], [1], [0, 0, 1, 1], [], []>, precision = #tpu.contract_precision<fp32>} : vector<8x32xf32>, vector<32x24xf32>, vector<8x24xf32> -> vector<8x24xf32>
    %c0_3 = arith.constant 0 : index
    %c0_4 = arith.constant 0 : index
    %3 = vector.load %arg3[%c0_3, %c0_4] : memref<8x24xf32, #tpu.memory_space<vmem>>, vector<8x24xf32>
    tpu.vector_store %arg3[%c0_3, %c0_4], %2 {strides = array<i32>} : memref<8x24xf32, #tpu.memory_space<vmem>>, vector<8x24xf32>,
    return
  }
  func.func @transform_0(%arg0: i32) -> (i32, i32) {
    %c0_i32 = arith.constant 0 : i32
    %c0_i32_0 = arith.constant 0 : i32
    return %arg0, %c0_i32 : i32, i32
  }
  func.func @transform_1(%arg0: i32) -> (i32, i32) {
    %c0_i32 = arith.constant 0 : i32
    %c0_i32_0 = arith.constant 0 : i32
    %c0_i32_1 = arith.constant 0 : i32
    return %c0_i32, %c0_i32_0 : i32, i32
  }
  func.func @transform_2(%arg0: i32) -> (i32, i32) {
    %c0_i32 = arith.constant 0 : i32
    %c0_i32_0 = arith.constant 0 : i32
    return %arg0, %c0_i32 : i32, i32
  }
}

</mosaic_0001>

<bundles_post_ra>
// kernel: _lambda_.1
= control target key start
LH: loop header
LB: loop body
LE: loop exit
PB: predicated region body
PF: predicated region fallthrough
CT: control target
= control target key end

     0   :  { %vm16_vm0 = vcmask 261120   ;;  %v655_v0 = vmov 0.0|0.0   ;;  %vm656_vm1 = vmmov 0   ;;  %v657_v8 = vmov 0.0   ;;  %s710_s1 = inlined_call_operand.vmem [shape: f32[32,24], index: 1, kind: input, shape index: {}]   ;;  %s711_s0 = inlined_call_operand.vmem [shape: f32[8,32], index: 0, kind: input, shape index: {}]   ;;  %s712_s2 = inlined_call_operand.vmem [shape: f32[8,24], index: 2, kind: output, shape index: {}]  }
   0x1   :  { %607 = vmatprep.subr.bf16.mxu1 %v655_v0  ;;  %625 = vmatprep.subr.bf16.mxu0 %v655_v0  ;;  %v12_v1 = vld [vmem:[%s710_s1] sm:$0xff]  ;;  %v13_v2 = vld [vmem:[%s710_s1 + $0x8] sm:$0xff]  ;;  %v14_v3 = vld [vmem:[%s710_s1 + $0x10] sm:$0xff]  ;;  %vm505_vm2 = vcmask 195584  }
   0x2   :  { %v21_v4 = vand.u32 4294901760, %v12_v1  ;;  %v24_v5 = vand.u32 4294901760, %v13_v2  ;;  %v15_v6 = vld [vmem:[%s710_s1 + $0x18] sm:$0xff]  ;;  %v27_v7 = vand.u32 4294901760, %v14_v3  ;;  %549 = vmatprep.mubr.msk.f32.mxu1 %vm656_vm1, %v657_v8  ;;  %582 = vmatprep.mubr.msk.f32.mxu0 %vm656_vm1, %v657_v8  ;;  %v11_v9 = vld [vmem:[%s711_s0] sm:$0xff] }
   0x3   :  { %v30_v10 = vand.u32 4294901760, %v15_v6  ;;  %v18_v11 = vsel %vm16_vm0, %v11_v9, 0 }
   0x4   :  { %v608_v12 = vpack.c.bf16 %v24_v5, %v21_v4  ;;  %v101_v13 = vsub.f32 %v12_v1, %v21_v4  ;;  %v108_v14 = vsub.f32 %v13_v2, %v24_v5  ;;  %v115_v15 = vsub.f32 %v14_v3, %v27_v7 }
   0x5   :  { %v122_v16 = vsub.f32 %v15_v6, %v30_v10  ;;  %v89_v17 = vand.u32 4294901760, %v18_v11  ;;  %v611_v18 = vpack.c.bf16 %v30_v10, %v27_v7 }
   0x6   :  { %609 = vmatpush3.bf16.msra.mxu1 %v608_v12  ;;  %627 = vmatpush3.bf16.msra.mxu0 %v608_v12  ;;  %v102_v19 = vand.u32 4294901760, %v101_v13  ;;  %v109_v20 = vand.u32 4294901760, %v108_v14  ;;  %v116_v21 = vand.u32 4294901760, %v115_v15  ;;  %v620_v39 = vpack.c.bf16 %v108_v14, %v101_v13 }
   0x7   :  { %610 = vmatprep.subr.bf16.mxu1 %v655_v0  ;;  %628 = vmatprep.subr.bf16.mxu0 %v655_v0  ;;  %v90_v22 = vsub.f32 %v18_v11, %v89_v17  ;;  %v123_v23 = vand.u32 4294901760, %v122_v16  ;;  %v623_v40 = vpack.c.bf16 %v122_v16, %v115_v15 }
   0x8   :  { %v103_v24 = vsub.f32 %v101_v13, %v102_v19  ;;  %v110_v25 = vsub.f32 %v108_v14, %v109_v20  ;;  %v117_v26 = vsub.f32 %v115_v15, %v116_v21  ;;  %v632_v31 = vpack.c.bf16 %v109_v20, %v102_v19 }
   0x9   :  { %v91_v27 = vand.u32 4294901760, %v90_v22  ;;  %v124_v28 = vsub.f32 %v122_v16, %v123_v23  ;;  %v635_v37 = vpack.c.bf16 %v123_v23, %v116_v21 }
   0xa   :  { %612 = vmatpush3.bf16.msra.mxu1 %v611_v18  ;;  %630 = vmatpush3.bf16.msra.mxu0 %v611_v18  ;;  %v104_v29 = vand.u32 4294901760, %v103_v24  ;;  %v111_v30 = vand.u32 4294901760, %v110_v25  ;;  %v118_v34 = vand.u32 4294901760, %v117_v26 }
   0xb   :  { %v92_v32 = vsub.f32 %v90_v22, %v91_v27  ;;  %613 = vmatprep.subr.bf16.mxu1 %v655_v0  ;;  %631 = vmatprep.subr.bf16.mxu0 %v655_v0  ;;  %v125_v35 = vand.u32 4294901760, %v124_v28 }
   0xc   :  { %v614_v33 = vpack.c.bf16 %v111_v30, %v104_v29 }
   0xd   :  { %v93_v36 = vand.u32 4294901760, %v92_v32  ;;  %583 = vmatmul.mubr.f32.vlgmr.msra.gmra.mrb[0].mxu0 %v91_v27  ;;  %v617_v38 = vpack.c.bf16 %v125_v35, %v118_v34 }
   0xe   :  { %633 = vmatpush3.bf16.msra.mxu0 %v632_v31  ;;  %593 = vmatprep.mubr.msk.f32.mxu0 %vm656_vm1, %v657_v8 }
   0xf   :  { %550 = vmatmul.mubr.f32.vlgmr.msra.gmra.mrb[0].mxu1 %v93_v36  ;;  %634 = vmatprep.subr.bf16.mxu0 %v655_v0 }
  0x10   :  { %615 = vmatpush3.bf16.msra.mxu1 %v614_v33  ;;  %560 = vmatprep.mubr.msk.f32.mxu1 %vm656_vm1, %v657_v8 }
  0x11   :  { %616 = vmatprep.subr.bf16.mxu1 %v655_v0 }
  0x12   :  { %636 = vmatpush3.bf16.msra.mxu0 %v635_v37 }
  0x13   :  { %637 = vmatprep.subr.bf16.mxu0 %v655_v0 }
  0x14   :  { %618 = vmatpush3.bf16.msra.mxu1 %v617_v38 }
  0x15   :  { %619 = vmatprep.subr.bf16.mxu1 %v655_v0  ;;  %594 = vmatmul.mubr.f32.vlgmr.msra.gmra.mrb[0].mxu0 %v89_v17 }
  0x16   :  { %639 = vmatpush3.bf16.msra.mxu0 %v608_v12  ;;  %604 = vmatprep.mubr.msk.f32.mxu0 %vm656_vm1, %v657_v8 }
  0x17   :  { %561 = vmatmul.mubr.f32.vlgmr.msra.gmra.mrb[0].mxu1 %v89_v17  ;;  %640 = vmatprep.subr.bf16.mxu0 %v655_v0 }
  0x18   :  { %621 = vmatpush3.bf16.msra.mxu1 %v620_v39  ;;  %571 = vmatprep.mubr.msk.f32.mxu1 %vm656_vm1, %v657_v8 }
  0x19   :  { %622 = vmatprep.subr.bf16.mxu1 %v655_v0 }
  0x1a   :  { %642 = vmatpush3.bf16.msra.mxu0 %v611_v18 }
  0x1c   :  { %624 = vmatpush3.bf16.msra.mxu1 %v623_v40 }
  0x1d   :  { %605 = vmatmul.mubr.f32.vlgmr.msra.gmra.mrb[0].mxu0 %v89_v17 }
  0x1f   :  { %572 = vmatmul.mubr.f32.vlgmr.msra.gmra.mrb[0].mxu1 %v90_v22 }
  0xf0   :  { %v501_v41 = vpop.f32.mrb[0].mxu0 }
  0xf1   :  { %v606_v42 = vpop.f32.mrb[1].mxu0 }
  0xf2   :  { %v266_v43 = vpop.f32.mrb[0].mxu1 }
  0xf3   :  { %v643_v44 = vadd.f32 %v501_v41, %v266_v43  ;;  %v573_v45 = vpop.f32.mrb[1].mxu1 }
  0xf5   :  { %506 = vst.msk [vmem:[%s712_s2] sm:$0xff] %vm505_vm2, %v643_v44 }

</bundles_post_ra>
